<compile_context>
chip_gen: v5e
topology: v5e:2x2
jax: 0.10.0
libtpu: 0.0.40
codegen_flags: <defaults>
</compile_context>

<pallas_src>
import functools

import jax
import jax.numpy as jnp
from jax.experimental import pallas as pl
from jax.experimental.pallas import tpu as pltpu

# ---- model hyper-parameters (small, consistent with the module) ----
NFEATS = 32            # args.nFeats
DIM = NFEATS           # bidirectional=False, enlarge=0  -> self.dim = nFeats
OUTDIM = 1             # Dot(..., outdim=1)
G_BATCH = 2            # number of g_vec rows
K_REP = 4              # p_vec.shape[0] // g_vec.shape[0]  (candidates per g row)
LANE_TILE = 128        # pair-index tile along lanes (vreg lane width)


# ---------------- Pallas kernel: bilinear form, lane-dense ----------------
def dot_bilinear_kernel(xT_ref, pT_ref, wT_ref, b_ref, out_ref):
    """Transposed bilinear: out[0, b] = x[:, b] . (W^T @ x)[:, b] ... see below.

    xT_ref: (D, TP)  expanded g_vec, transposed (features on sublanes, pairs on lanes)
    pT_ref: (D, TP)  p_vec, transposed
    wT_ref: (D, D)   W[0]^T  (so that W^T @ xT gives tT[j, b] = (x[b] @ W)[j])
    b_ref : (1, 1)   bilinear bias (outdim = 1)
    out_ref:(1, TP)  lane-dense scores
    """
    # one MXU push: (D, D) @ (D, TP) -> (D, TP); full 128-lane result width
    tT = jnp.dot(wT_ref[...], xT_ref[...], preferred_element_type=jnp.float32)
    # second contraction as VPU multiply + cross-sublane (XLU) reduce -> lane-dense row
    prod = tT * pT_ref[...]                               # (D, TP)
    out_ref[...] = jnp.sum(prod, axis=0, keepdims=True) + b_ref[...]   # (1, TP)


# ---------------- wrapper: expansion glue + pallas_call ----------------
@functools.partial(jax.jit, static_argnames=("aligned",))
def dot_forward(g_vec, p_vec, params, aligned=False):
    """g_vec: (G, D), p_vec: (P, D) with P = G*k  ->  scores (P, 1) (matches torch)."""
    P, D = p_vec.shape
    if not aligned:
        k = P // g_vec.shape[0]
        # torch: g_vec.repeat(1, k).view(P, -1)  ==  each row repeated k times consecutively
        x = jnp.repeat(g_vec, k, axis=0)                  # (P, D)
    else:
        x = g_vec

    # lane-dense layout: pairs along lanes (padded to a multiple of 128), features on sublanes
    P_pad = ((P + LANE_TILE - 1) // LANE_TILE) * LANE_TILE
    xT = jnp.zeros((D, P_pad), jnp.float32).at[:, :P].set(x.T.astype(jnp.float32))
    pT = jnp.zeros((D, P_pad), jnp.float32).at[:, :P].set(p_vec.T.astype(jnp.float32))
    wT = params['w'][0].T.astype(jnp.float32)             # (D, D) = W[0]^T
    b = params['b'].reshape(1, 1).astype(jnp.float32)     # (1, 1)

    n_tiles = P_pad // LANE_TILE
    out = pl.pallas_call(
        dot_bilinear_kernel,
        out_shape=jax.ShapeDtypeStruct((1, P_pad), jnp.float32),
        grid=(n_tiles,),
        in_specs=[
            pl.BlockSpec((D, LANE_TILE), lambda i: (0, i)),   # xT tile
            pl.BlockSpec((D, LANE_TILE), lambda i: (0, i)),   # pT tile
            pl.BlockSpec((D, D), lambda i: (0, 0)),           # W^T (resident)
            pl.BlockSpec((1, 1), lambda i: (0, 0)),           # bias
        ],
        out_specs=pl.BlockSpec((1, LANE_TILE), lambda i: (0, i)),
        compiler_params=pltpu.CompilerParams(
            dimension_semantics=("parallel",)),               # shards tiles across TCs (v7x)
    )(xT, pT, wT, b)

    return out[0, :P].reshape(P, OUTDIM)


# ---------------- pure-JAX reference (nn.Bilinear semantics) ----------------
def dot_reference(g_vec, p_vec, params, aligned=False):
    P, D = p_vec.shape
    if not aligned:
        k = P // g_vec.shape[0]
        x = jnp.repeat(g_vec, k, axis=0)
    else:
        x = g_vec
    W = params['w']                                   # (OUTDIM, D, D)
    b = params['b']                                   # (OUTDIM,)
    # torch.nn.Bilinear: y[n, o] = sum_{i,j} x[n,i] * W[o,i,j] * p[n,j] + b[o]
    return jnp.einsum('ni,oij,nj->no', x, W, p_vec) + b


def init_params(key):
    kw, kb = jax.random.split(key)
    return {
        # kaiming-normal-ish bilinear weight (as in Dot.__init__ init.kaiming_normal_)
        'w': jax.random.normal(kw, (OUTDIM, DIM, DIM), jnp.float32) * (2.0 / DIM) ** 0.5,
        'b': jax.random.normal(kb, (OUTDIM,), jnp.float32) * 0.05,
    }


if __name__ == "__main__":
    key = jax.random.PRNGKey(0)
    kp, kg, kpv = jax.random.split(key, 3)

    params = init_params(kp)
    g_vec = jax.random.normal(kg, (G_BATCH, DIM), jnp.float32)           # (2, 32)
    p_vec = jax.random.normal(kpv, (G_BATCH * K_REP, DIM), jnp.float32)  # (8, 32)

    score = dot_forward(g_vec, p_vec, params)
    score = jax.block_until_ready(score)

    ref = dot_reference(g_vec, p_vec, params)
    assert score.shape == (G_BATCH * K_REP, OUTDIM)
    assert jnp.allclose(score, ref, atol=1e-3, rtol=1e-3), (score, ref)

    print("KERNEL_OK")
</pallas_src>

<mosaic_0001>
module attributes {stable_mosaic.version = 11 : i64} {
  func.func @dot_bilinear_kernel(%arg0: i32, %arg1: memref<32x128xf32, #tpu.memory_space<vmem>>, %arg2: memref<32x128xf32, #tpu.memory_space<vmem>>, %arg3: memref<32x32xf32, #tpu.memory_space<vmem>>, %arg4: memref<1x1xf32, #tpu.memory_space<vmem>>, %arg5: memref<1x128xf32, #tpu.memory_space<vmem>>) attributes {dimension_semantics = [#tpu.dimension_semantics<parallel>], iteration_bounds = array<i64: 1>, scalar_prefetch = 0 : i64, scratch_operands = 0 : i64, tpu.core_type = #tpu.core_type<tc>, window_params = [{transform_indices = @transform_0, window_bounds = array<i64: 32, 128>}, {transform_indices = @transform_1, window_bounds = array<i64: 32, 128>}, {pipeline_mode = #tpu.pipeline_mode<synchronous>, transform_indices = @transform_2, window_bounds = array<i64: 32, 32>}, {pipeline_mode = #tpu.pipeline_mode<synchronous>, transform_indices = @transform_3, window_bounds = array<i64: 1, 1>}, {transform_indices = @transform_4, window_bounds = array<i64: 1, 128>}]} {
    %c0 = arith.constant 0 : index
    %c0_0 = arith.constant 0 : index
    %0 = vector.load %arg3[%c0, %c0_0] : memref<32x32xf32, #tpu.memory_space<vmem>>, vector<32x32xf32>
    %c0_1 = arith.constant 0 : index
    %c0_2 = arith.constant 0 : index
    %1 = vector.load %arg1[%c0_1, %c0_2] : memref<32x128xf32, #tpu.memory_space<vmem>>, vector<32x128xf32>
    %cst = arith.constant dense<0.000000e+00> : vector<32x128xf32>
    %2 = tpu.matmul %0, %1, %cst {dimension_numbers = #tpu.dot_dimension_numbers<[1], [0], [0], [1], [0, 0, 1, 1], [], []>} : vector<32x32xf32>, vector<32x128xf32>, vector<32x128xf32> -> vector<32x128xf32>
    %c0_3 = arith.constant 0 : index
    %c0_4 = arith.constant 0 : index
    %3 = vector.load %arg2[%c0_3, %c0_4] : memref<32x128xf32, #tpu.memory_space<vmem>>, vector<32x128xf32>
    %4 = arith.mulf %2, %3 : vector<32x128xf32>
    %cst_5 = arith.constant dense<0.000000e+00> : vector<128xf32>
    %5 = vector.multi_reduction <add>, %4, %cst_5 [0] : vector<32x128xf32> to vector<128xf32>
    %6 = vector.shape_cast %5 : vector<128xf32> to vector<1x128xf32>
    %c0_6 = arith.constant 0 : index
    %c0_7 = arith.constant 0 : index
    %7 = vector.load %arg4[%c0_6, %c0_7] : memref<1x1xf32, #tpu.memory_space<vmem>>, vector<1x1xf32>
    %8 = vector.broadcast %7 : vector<1x1xf32> to vector<1x128xf32>
    %9 = arith.addf %6, %8 : vector<1x128xf32>
    %c0_8 = arith.constant 0 : index
    %c0_9 = arith.constant 0 : index
    %10 = vector.load %arg5[%c0_8, %c0_9] : memref<1x128xf32, #tpu.memory_space<vmem>>, vector<1x128xf32>
    tpu.vector_store %arg5[%c0_8, %c0_9], %9 {strides = array<i32>} : memref<1x128xf32, #tpu.memory_space<vmem>>, vector<1x128xf32>,
    return
  }
  func.func @transform_0(%arg0: i32) -> (i32, i32) {
    %c0_i32 = arith.constant 0 : i32
    %c0_i32_0 = arith.constant 0 : i32
    return %c0_i32, %arg0 : i32, i32
  }
  func.func @transform_1(%arg0: i32) -> (i32, i32) {
    %c0_i32 = arith.constant 0 : i32
    %c0_i32_0 = arith.constant 0 : i32
    return %c0_i32, %arg0 : i32, i32
  }
  func.func @transform_2(%arg0: i32) -> (i32, i32) {
    %c0_i32 = arith.constant 0 : i32
    %c0_i32_0 = arith.constant 0 : i32
    %c0_i32_1 = arith.constant 0 : i32
    return %c0_i32, %c0_i32_0 : i32, i32
  }
  func.func @transform_3(%arg0: i32) -> (i32, i32) {
    %c0_i32 = arith.constant 0 : i32
    %c0_i32_0 = arith.constant 0 : i32
    %c0_i32_1 = arith.constant 0 : i32
    return %c0_i32, %c0_i32_0 : i32, i32
  }
  func.func @transform_4(%arg0: i32) -> (i32, i32) {
    %c0_i32 = arith.constant 0 : i32
    %c0_i32_0 = arith.constant 0 : i32
    return %c0_i32, %arg0 : i32, i32
  }
}

</mosaic_0001>

<bundles_post_ra>
// kernel: dot_forward.1
= control target key start
LH: loop header
LB: loop body
LE: loop exit
PB: predicated region body
PF: predicated region fallthrough
CT: control target
= control target key end

     0   :  { %v117_v2 = vmov 0   ;;  %vm27_vm0 = vcmask 261120   ;;  %s185_s0 = inlined_call_operand.vmem [shape: f32[32,128], index: 0, kind: input, shape index: {}]   ;;  %s186_s3 = inlined_call_operand.<no memory space> [shape: f32[1,1], index: 3, kind: input, shape index: {}]   ;;  %s187_s2 = inlined_call_operand.vmem [shape: f32[32,32], index: 2, kind: input, shape index: {}]   ;;  %s188_s1 = inlined_call_operand.vmem [shape: f32[32,128], index: 1, kind: input, shape index: {}]   ;;  %s189_s4 = inlined_call_operand.vmem [shape: f32[1,128], index: 4, kind: output, shape index: {}]  }
   0x1   :  { %v26_v0 = vld [vmem:[%s185_s0 + $0x18] sm:$0xff]  ;;  %v25_v1 = vld [vmem:[%s185_s0 + $0x10] sm:$0xff]  ;;  %116 = vset.pattern.permute.xlu0 %v117_v2  ;;  %v9_v3 = vstv %s186_s3  ;;  %v24_v4 = vld [vmem:[%s185_s0 + $0x8] sm:$0xff] }
   0x2   :  { %104 = vmatpush.msra.mxu2 %v26_v0  ;;  %105 = vmatpush.msra.mxu3 %v26_v0  ;;  %10 = vst [vmem:[#allocation2] sm:$0x1] %v9_v3  ;;  %v23_v5 = vld [vmem:[%s185_s0] sm:$0xff]  ;;  %v21_v6 = vld [vmem:[%s187_s2 + $0x10] sm:$0xff]  ;;  %v22_v7 = vld [vmem:[%s187_s2 + $0x18] sm:$0xff] }
   0x3   :  { %52 = vmatpush.msra.mxu0 %v26_v0  ;;  %103 = vmatpush.msra.mxu1 %v26_v0  ;;  %v19_v8 = vld [vmem:[%s187_s2] sm:$0xff]  ;;  %v20_v9 = vld [vmem:[%s187_s2 + $0x8] sm:$0xff]  ;;  %v71_v17 = vld [vmem:[%s188_s1 + $0x10] sm:$0xff] }
   0x4   :  { %107 = vmatpush.msra.mxu2 %v25_v1  ;;  %108 = vmatpush.msra.mxu3 %v25_v1  ;;  %v69_v11 = vld [vmem:[%s188_s1] sm:$0xff]  ;;  %v70_v12 = vld [vmem:[%s188_s1 + $0x8] sm:$0xff]  ;;  %v72_v18 = vld [vmem:[%s188_s1 + $0x18] sm:$0xff] }
   0x5   :  { %53 = vmatpush.msra.mxu0 %v25_v1  ;;  %106 = vmatpush.msra.mxu1 %v25_v1 }
   0x6   :  { %110 = vmatpush.msra.mxu2 %v24_v4  ;;  %111 = vmatpush.msra.mxu3 %v24_v4 }
   0x7   :  { %54 = vmatpush.msra.mxu0 %v24_v4  ;;  %109 = vmatpush.msra.mxu1 %v24_v4 }
   0x8   :  { %113 = vmatpush.msra.mxu2 %v23_v5  ;;  %114 = vmatpush.msra.mxu3 %v23_v5 }
   0x9   :  { %101 = vmatmul.msk.f32.vlgmr.msra.gmra.mxu2 %vm27_vm0, %v21_v6  ;;  %102 = vmatmul.msk.f32.vlgmr.msra.gmra.mxu3 %vm27_vm0, %v22_v7  ;;  %v86_v10 = vld [vmem:[#allocation2] sm:$0x1] }
   0xa   :  { %55 = vmatpush.msra.mxu0 %v23_v5  ;;  %112 = vmatpush.msra.mxu1 %v23_v5 }
   0xb   :  { %99 = vmatmul.msk.f32.vlgmr.msra.gmra.mxu0 %vm27_vm0, %v19_v8  ;;  %100 = vmatmul.msk.f32.vlgmr.msra.gmra.mxu1 %vm27_vm0, %v20_v9 }
   0xc   :  { %89 = vperm.xlu0 %116, %v86_v10  }
  0x7e   :  { %v90_v29 = vpop.permute.xlu0 %89 }
  0x7f   :  { %v92_v32 = vperm.slane %v90_v29, 0 }
  0x88   :  { %v57_v13 = vpop.f32.mrf.mxu0  ;;  %v60_v14 = vpop.f32.mrf.mxu1 }
  0x89   :  { %v73_v15 = vmul.f32 %v69_v11, %v57_v13  ;;  %v74_v16 = vmul.f32 %v70_v12, %v60_v14 }
  0x8b   :  { %v77_v19 = vadd.f32 %v74_v16, %v73_v15 }
  0x8c   :  { %v63_v20 = vpop.f32.mrf.mxu2  ;;  %v66_v21 = vpop.f32.mrf.mxu3 }
  0x8d   :  { %v75_v22 = vmul.f32 %v71_v17, %v63_v20  ;;  %v76_v23 = vmul.f32 %v72_v18, %v66_v21 }
  0x8f   :  { %v78_v24 = vadd.f32 %v77_v19, %v75_v22 }
  0x91   :  { %v79_v25 = vadd.f32 %v78_v24, %v76_v23 }
  0x93   :  { %v80_v26 = vrot.slane %v79_v25, 4 }
  0x95   :  { %v81_v27 = vadd.f32 %v80_v26, %v79_v25 }
  0x97   :  { %v82_v28 = vrot.slane %v81_v27, 2 }
  0x99   :  { %v83_v30 = vadd.f32 %v82_v28, %v81_v27 }
  0x9b   :  { %v84_v31 = vrot.slane %v83_v30, 1 }
  0x9d   :  { %v85_v33 = vadd.f32 %v84_v31, %v83_v30 }
  0x9f   :  { %v93_v34 = vadd.f32 %v92_v32, %v85_v33 }
  0xa1   :  { %94 = vst [vmem:[%s189_s4] sm:$0x1] %v93_v34 }

</bundles_post_ra>
